<compile_context>
chip_gen: v7x
topology: tpu7x:2x2x1
jax: 0.10.0
libtpu: 0.0.40
codegen_flags: <defaults>
</compile_context>

<pallas_src>
import jax
import jax.numpy as jnp
from jax import lax
from jax.experimental import pallas as pl
from jax.experimental.pallas import tpu as pltpu

EPS = 1e-5
HID = 128
LANE = 128
SUBLANE_BF16 = 16          # bf16 sublane tile -> round batch up to this
MAX_SINGLE_SHOT_BATCH = 8192  # guard: beyond this, use a batch-tiled grid


# ---------------------------------------------------------------------------
# Kernel
# ---------------------------------------------------------------------------
def _make_kernel(b_true, b_pad):
    """Build the fused 3x(Linear -> BN(train) -> ReLU) kernel.

    b_true : real batch size (stats divide by this)
    b_pad  : padded batch size (multiple of 16); padded rows masked to zero.
    """
    inv_b = 1.0 / float(b_true)
    need_mask = b_pad != b_true

    def kernel(x_ref, w1_ref, w23_ref, bn_ref, o_ref):
        # x_ref  : (b_pad, in_f)   f32   -- padded batch rows are exact zeros
        # w1_ref : (in_f, 128)     bf16
        # w23_ref: (2, 128, 128)   bf16  -- [w2, w3 padded to 128 out-lanes]
        # bn_ref : (8, 128)        f32   -- rows [g1, be1, g2, be2, g3p, be3p, 0, 0]
        # o_ref  : (b_pad, 128)    f32   -- lane-dense; cols >= code_size are 0
        if need_mask:
            row_ids = lax.broadcasted_iota(jnp.int32, (b_pad, 1), 0)
            row_mask = (row_ids < b_true).astype(jnp.float32)

        def bn_relu(h, gamma, beta):
            # Single-pass stats: sum and sum-of-squares are independent, so the
            # two sublane reduces overlap; f32 accumulation on post-matmul
            # magnitudes makes E[x^2]-E[x]^2 cancellation a non-issue here.
            s = jnp.sum(h, axis=0, keepdims=True) * inv_b           # (1, F)
            sq = jnp.sum(h * h, axis=0, keepdims=True) * inv_b      # (1, F)
            var = jnp.maximum(sq - s * s, 0.0)
            scale = gamma * lax.rsqrt(var + EPS)                    # (1, F)
            shift = beta - s * scale                                # (1, F)
            out = jnp.maximum(h * scale + shift, 0.0)               # (B, F)
            if need_mask:
                out = out * row_mask    # keep padded rows at exact zero
            return out

        x = x_ref[...].astype(jnp.bfloat16)

        # layer 1: Linear(2*code_size -> 128)  [bias cancelled by BN] + BN + ReLU
        h = jnp.dot(x, w1_ref[...], preferred_element_type=jnp.float32)
        h = bn_relu(h, bn_ref[0:1, :], bn_ref[1:2, :])

        # layer 2: Linear(128 -> 128) + BN + ReLU
        h = jnp.dot(h.astype(jnp.bfloat16), w23_ref[0],
                    preferred_element_type=jnp.float32)
        h = bn_relu(h, bn_ref[2:3, :], bn_ref[3:4, :])

        # layer 3: Linear(128 -> code_size, padded to 128 lanes) + BN + ReLU
        # Padded gamma/beta lanes are exactly 0 -> padded outputs are exactly 0.
        h = jnp.dot(h.astype(jnp.bfloat16), w23_ref[1],
                    preferred_element_type=jnp.float32)
        h = bn_relu(h, bn_ref[4:5, :], bn_ref[5:6, :])

        o_ref[...] = h

    return kernel


# ---------------------------------------------------------------------------
# One-time parameter packing (hoisted out of the per-call path)
# ---------------------------------------------------------------------------
def pack_params(params):
    """Pack weights/BN params once.  Returns a dict of device arrays."""
    in_f = params["w1"].shape[0]
    code_size = params["w3"].shape[1]
    assert code_size <= LANE and in_f <= LANE

    w1 = params["w1"].astype(jnp.bfloat16)                               # (in_f,128)
    w3_p = jnp.pad(params["w3"], ((0, 0), (0, LANE - code_size)))        # (128,128)
    w23 = jnp.stack([params["w2"], w3_p]).astype(jnp.bfloat16)           # (2,128,128)

    bn = jnp.zeros((8, LANE), jnp.float32)
    bn = bn.at[0, :].set(params["g1"]).at[1, :].set(params["be1"])
    bn = bn.at[2, :].set(params["g2"]).at[3, :].set(params["be2"])
    bn = bn.at[4, :code_size].set(params["g3"])
    bn = bn.at[5, :code_size].set(params["be3"])

    return dict(w1=w1, w23=w23, bn=bn)


# ---------------------------------------------------------------------------
# Forward wrappers
# ---------------------------------------------------------------------------
def regressor_forward_padded(x, packed):
    """Fast path: returns the lane-dense (B_pad, 128) f32 block (no post-kernel
    slice / copy).  Rows >= B and cols >= code_size are exact zeros."""
    B, _ = x.shape
    assert B >= 2, "BatchNorm1d in training mode requires batch >= 2"
    assert B <= MAX_SINGLE_SHOT_BATCH, \
        "single-grid-point path; use a batch-tiled grid for very large B"

    b_pad = ((B + SUBLANE_BF16 - 1) // SUBLANE_BF16) * SUBLANE_BF16
    x_p = x if b_pad == B else jnp.pad(x, ((0, b_pad - B), (0, 0)))

    vmem = pl.BlockSpec(memory_space=pltpu.MemorySpace.VMEM)
    return pl.pallas_call(
        _make_kernel(B, b_pad),
        out_shape=jax.ShapeDtypeStruct((b_pad, LANE), jnp.float32),
        in_specs=[vmem, vmem, vmem, vmem],
        out_specs=vmem,
    )(x_p, packed["w1"], packed["w23"], packed["bn"])


def regressor_forward(x, packed, *, code_size):
    """Module-semantics wrapper: (B, 2*code_size) -> (B, code_size)."""
    out_pad = regressor_forward_padded(x, packed)
    return out_pad[: x.shape[0], :code_size]


# ---------------------------------------------------------------------------
# Synthetic parameters (PyTorch-equivalent shapes / init)
# ---------------------------------------------------------------------------
def init_params(key, code_size):
    """Linear weights stored as (in_features, out_features) so math is x @ W + b
    (== PyTorch's x @ W.T).  Biases kept for the reference but NOT used by the
    kernel (cancelled exactly by BN's mean subtraction)."""
    ks = jax.random.split(key, 6)
    in1, h, out3 = 2 * code_size, HID, code_size

    def lin(k, fan_in, fan_out):
        bound = fan_in ** -0.5
        kw, kb = jax.random.split(k)
        w = jax.random.uniform(kw, (fan_in, fan_out), jnp.float32, -bound, bound)
        b = jax.random.uniform(kb, (fan_out,), jnp.float32, -bound, bound)
        return w, b

    w1, b1 = lin(ks[0], in1, h)
    w2, b2 = lin(ks[1], h, h)
    w3, b3 = lin(ks[2], h, out3)

    # BatchNorm gamma ~ N(1, 0.02), beta = 0 (per _default_gaussian_weight_init).
    g1 = 1.0 + 0.02 * jax.random.normal(ks[3], (h,), jnp.float32)
    g2 = 1.0 + 0.02 * jax.random.normal(ks[4], (h,), jnp.float32)
    g3 = 1.0 + 0.02 * jax.random.normal(ks[5], (out3,), jnp.float32)
    be1 = jnp.zeros((h,), jnp.float32)
    be2 = jnp.zeros((h,), jnp.float32)
    be3 = jnp.zeros((out3,), jnp.float32)

    return dict(w1=w1, b1=b1, g1=g1, be1=be1,
                w2=w2, b2=b2, g2=g2, be2=be2,
                w3=w3, b3=b3, g3=g3, be3=be3)


# ---------------------------------------------------------------------------
# References
# ---------------------------------------------------------------------------
def _reference_forward_f32(x, p):
    """Plain-JAX f32 reference with the linear biases (PyTorch semantics)."""
    def bn_relu(h, g, b):
        m = h.mean(0, keepdims=True)
        v = ((h - m) ** 2).mean(0, keepdims=True)
        return jnp.maximum(g * (h - m) / jnp.sqrt(v + EPS) + b, 0.0)

    h = bn_relu(x @ p["w1"] + p["b1"], p["g1"], p["be1"])
    h = bn_relu(h @ p["w2"] + p["b2"], p["g2"], p["be2"])
    h = bn_relu(h @ p["w3"] + p["b3"], p["g3"], p["be3"])
    return h


def _reference_forward_matched(x, p):
    """Reference mirroring the kernel's math (bf16 matmuls, no bias,
    single-pass variance)."""
    def dot(a, w):
        return jnp.dot(a.astype(jnp.bfloat16), w.astype(jnp.bfloat16),
                       preferred_element_type=jnp.float32)

    def bn_relu(h, g, b):
        m = h.mean(0, keepdims=True)
        v = jnp.maximum((h * h).mean(0, keepdims=True) - m * m, 0.0)
        s = g * lax.rsqrt(v + EPS)
        return jnp.maximum(h * s + (b - m * s), 0.0)

    h = bn_relu(dot(x, p["w1"]), p["g1"], p["be1"])
    h = bn_relu(dot(h, p["w2"]), p["g2"], p["be2"])
    h = bn_relu(dot(h, p["w3"]), p["g3"], p["be3"])
    return h


# ---------------------------------------------------------------------------
if __name__ == "__main__":
    code_size = 32
    batch = 16  # multiple of 16 -> full bf16 sublane tiles, no batch padding

    key = jax.random.PRNGKey(0)
    k_x, k_p, k_x2 = jax.random.split(key, 3)

    x = jax.random.normal(k_x, (batch, 2 * code_size), jnp.float32)
    params = init_params(k_p, code_size)

    # One-time packing (NOT in the per-call path).
    packed = jax.block_until_ready(pack_params(params))

    fwd = jax.jit(regressor_forward, static_argnames=("code_size",))
    out = jax.block_until_ready(fwd(x, packed, code_size=code_size))
    assert out.shape == (batch, code_size)

    # Tight check vs. a reference with identical (bf16, single-pass-var) math.
    ref_matched = _reference_forward_matched(x, params)
    assert jnp.allclose(out, ref_matched, atol=2e-3, rtol=2e-3), \
        float(jnp.max(jnp.abs(out - ref_matched)))

    # Looser check vs. the full-f32 PyTorch-semantics reference (with biases).
    ref_f32 = _reference_forward_f32(x, params)
    assert jnp.allclose(out, ref_f32, atol=1e-1, rtol=1e-1), \
        float(jnp.max(jnp.abs(out - ref_f32)))

    # Exercise the batch-padding + row-mask path (B=8 -> padded to 16).
    x2 = jax.random.normal(k_x2, (8, 2 * code_size), jnp.float32)
    out2 = jax.block_until_ready(fwd(x2, packed, code_size=code_size))
    ref2 = _reference_forward_matched(x2, params)
    assert out2.shape == (8, code_size)
    assert jnp.allclose(out2, ref2, atol=2e-3, rtol=2e-3), \
        float(jnp.max(jnp.abs(out2 - ref2)))

    print("KERNEL_OK")
</pallas_src>

<mosaic_0001>
module attributes {stable_mosaic.version = 11 : i64} {
  func.func @kernel(%arg0: memref<16x64xf32, #tpu.memory_space<vmem>>, %arg1: memref<64x128xbf16, #tpu.memory_space<vmem>>, %arg2: memref<2x128x128xbf16, #tpu.memory_space<vmem>>, %arg3: memref<8x128xf32, #tpu.memory_space<vmem>>, %arg4: memref<16x128xf32, #tpu.memory_space<vmem>>) attributes {dimension_semantics = [], scalar_prefetch = 0 : i64, scratch_operands = 0 : i64, tpu.core_type = #tpu.core_type<tc>} {
    %c0 = arith.constant 0 : index
    %c0_0 = arith.constant 0 : index
    %0 = vector.load %arg0[%c0, %c0_0] : memref<16x64xf32, #tpu.memory_space<vmem>>, vector<16x64xf32>
    %1 = arith.truncf %0 : vector<16x64xf32> to vector<16x64xbf16>
    %c0_1 = arith.constant 0 : index
    %c0_2 = arith.constant 0 : index
    %2 = vector.load %arg1[%c0_1, %c0_2] : memref<64x128xbf16, #tpu.memory_space<vmem>>, vector<64x128xbf16>
    %cst = arith.constant dense<0.000000e+00> : vector<16x128xf32>
    %3 = tpu.matmul %1, %2, %cst {dimension_numbers = #tpu.dot_dimension_numbers<[1], [0], [0], [1], [0, 0, 1, 1], [], []>} : vector<16x64xbf16>, vector<64x128xbf16>, vector<16x128xf32> -> vector<16x128xf32>
    %c0_3 = arith.constant 0 : index
    %c0_4 = arith.constant 0 : index
    %4 = vector.load %arg3[%c0_3, %c0_4] : memref<8x128xf32, #tpu.memory_space<vmem>>, vector<1x128xf32>
    %c1 = arith.constant 1 : index
    %c0_5 = arith.constant 0 : index
    %5 = vector.load %arg3[%c1, %c0_5] : memref<8x128xf32, #tpu.memory_space<vmem>>, vector<1x128xf32>
    %cst_6 = arith.constant dense<0.000000e+00> : vector<128xf32>
    %6 = vector.multi_reduction <add>, %3, %cst_6 [0] : vector<16x128xf32> to vector<128xf32>
    %7 = vector.shape_cast %6 : vector<128xf32> to vector<1x128xf32>
    %cst_7 = arith.constant 6.250000e-02 : f32
    %8 = vector.broadcast %cst_7 : f32 to vector<1x128xf32>
    %9 = arith.mulf %7, %8 : vector<1x128xf32>
    %10 = arith.mulf %3, %3 : vector<16x128xf32>
    %cst_8 = arith.constant dense<0.000000e+00> : vector<128xf32>
    %11 = vector.multi_reduction <add>, %10, %cst_8 [0] : vector<16x128xf32> to vector<128xf32>
    %12 = vector.shape_cast %11 : vector<128xf32> to vector<1x128xf32>
    %cst_9 = arith.constant 6.250000e-02 : f32
    %13 = vector.broadcast %cst_9 : f32 to vector<1x128xf32>
    %14 = arith.mulf %12, %13 : vector<1x128xf32>
    %15 = arith.mulf %9, %9 : vector<1x128xf32>
    %16 = arith.subf %14, %15 : vector<1x128xf32>
    %cst_10 = arith.constant 0.000000e+00 : f32
    %17 = vector.broadcast %cst_10 : f32 to vector<1x128xf32>
    %18 = arith.maximumf %16, %17 : vector<1x128xf32>
    %cst_11 = arith.constant 9.99999974E-6 : f32
    %19 = vector.broadcast %cst_11 : f32 to vector<1x128xf32>
    %20 = arith.addf %18, %19 : vector<1x128xf32>
    %21 = math.rsqrt %20 : vector<1x128xf32>
    %22 = arith.mulf %4, %21 : vector<1x128xf32>
    %23 = arith.mulf %9, %22 : vector<1x128xf32>
    %24 = arith.subf %5, %23 : vector<1x128xf32>
    %25 = vector.broadcast %22 : vector<1x128xf32> to vector<16x128xf32>
    %26 = arith.mulf %3, %25 : vector<16x128xf32>
    %27 = vector.broadcast %24 : vector<1x128xf32> to vector<16x128xf32>
    %28 = arith.addf %26, %27 : vector<16x128xf32>
    %cst_12 = arith.constant 0.000000e+00 : f32
    %29 = vector.broadcast %cst_12 : f32 to vector<16x128xf32>
    %30 = arith.maximumf %28, %29 : vector<16x128xf32>
    %31 = arith.truncf %30 : vector<16x128xf32> to vector<16x128xbf16>
    %c0_13 = arith.constant 0 : index
    %c0_14 = arith.constant 0 : index
    %c0_15 = arith.constant 0 : index
    %32 = vector.load %arg2[%c0_13, %c0_14, %c0_15] : memref<2x128x128xbf16, #tpu.memory_space<vmem>>, vector<1x128x128xbf16>
    %33 = vector.shape_cast %32 : vector<1x128x128xbf16> to vector<128x128xbf16>
    %cst_16 = arith.constant dense<0.000000e+00> : vector<16x128xf32>
    %34 = tpu.matmul %31, %33, %cst_16 {dimension_numbers = #tpu.dot_dimension_numbers<[1], [0], [0], [1], [0, 0, 1, 1], [], []>} : vector<16x128xbf16>, vector<128x128xbf16>, vector<16x128xf32> -> vector<16x128xf32>
    %c2 = arith.constant 2 : index
    %c0_17 = arith.constant 0 : index
    %35 = vector.load %arg3[%c2, %c0_17] : memref<8x128xf32, #tpu.memory_space<vmem>>, vector<1x128xf32>
    %c3 = arith.constant 3 : index
    %c0_18 = arith.constant 0 : index
    %36 = vector.load %arg3[%c3, %c0_18] : memref<8x128xf32, #tpu.memory_space<vmem>>, vector<1x128xf32>
    %cst_19 = arith.constant dense<0.000000e+00> : vector<128xf32>
    %37 = vector.multi_reduction <add>, %34, %cst_19 [0] : vector<16x128xf32> to vector<128xf32>
    %38 = vector.shape_cast %37 : vector<128xf32> to vector<1x128xf32>
    %cst_20 = arith.constant 6.250000e-02 : f32
    %39 = vector.broadcast %cst_20 : f32 to vector<1x128xf32>
    %40 = arith.mulf %38, %39 : vector<1x128xf32>
    %41 = arith.mulf %34, %34 : vector<16x128xf32>
    %cst_21 = arith.constant dense<0.000000e+00> : vector<128xf32>
    %42 = vector.multi_reduction <add>, %41, %cst_21 [0] : vector<16x128xf32> to vector<128xf32>
    %43 = vector.shape_cast %42 : vector<128xf32> to vector<1x128xf32>
    %cst_22 = arith.constant 6.250000e-02 : f32
    %44 = vector.broadcast %cst_22 : f32 to vector<1x128xf32>
    %45 = arith.mulf %43, %44 : vector<1x128xf32>
    %46 = arith.mulf %40, %40 : vector<1x128xf32>
    %47 = arith.subf %45, %46 : vector<1x128xf32>
    %cst_23 = arith.constant 0.000000e+00 : f32
    %48 = vector.broadcast %cst_23 : f32 to vector<1x128xf32>
    %49 = arith.maximumf %47, %48 : vector<1x128xf32>
    %cst_24 = arith.constant 9.99999974E-6 : f32
    %50 = vector.broadcast %cst_24 : f32 to vector<1x128xf32>
    %51 = arith.addf %49, %50 : vector<1x128xf32>
    %52 = math.rsqrt %51 : vector<1x128xf32>
    %53 = arith.mulf %35, %52 : vector<1x128xf32>
    %54 = arith.mulf %40, %53 : vector<1x128xf32>
    %55 = arith.subf %36, %54 : vector<1x128xf32>
    %56 = vector.broadcast %53 : vector<1x128xf32> to vector<16x128xf32>
    %57 = arith.mulf %34, %56 : vector<16x128xf32>
    %58 = vector.broadcast %55 : vector<1x128xf32> to vector<16x128xf32>
    %59 = arith.addf %57, %58 : vector<16x128xf32>
    %cst_25 = arith.constant 0.000000e+00 : f32
    %60 = vector.broadcast %cst_25 : f32 to vector<16x128xf32>
    %61 = arith.maximumf %59, %60 : vector<16x128xf32>
    %62 = arith.truncf %61 : vector<16x128xf32> to vector<16x128xbf16>
    %c1_26 = arith.constant 1 : index
    %c0_27 = arith.constant 0 : index
    %c0_28 = arith.constant 0 : index
    %63 = vector.load %arg2[%c1_26, %c0_27, %c0_28] : memref<2x128x128xbf16, #tpu.memory_space<vmem>>, vector<1x128x128xbf16>
    %64 = vector.shape_cast %63 : vector<1x128x128xbf16> to vector<128x128xbf16>
    %cst_29 = arith.constant dense<0.000000e+00> : vector<16x128xf32>
    %65 = tpu.matmul %62, %64, %cst_29 {dimension_numbers = #tpu.dot_dimension_numbers<[1], [0], [0], [1], [0, 0, 1, 1], [], []>} : vector<16x128xbf16>, vector<128x128xbf16>, vector<16x128xf32> -> vector<16x128xf32>
    %c4 = arith.constant 4 : index
    %c0_30 = arith.constant 0 : index
    %66 = vector.load %arg3[%c4, %c0_30] : memref<8x128xf32, #tpu.memory_space<vmem>>, vector<1x128xf32>
    %c5 = arith.constant 5 : index
    %c0_31 = arith.constant 0 : index
    %67 = vector.load %arg3[%c5, %c0_31] : memref<8x128xf32, #tpu.memory_space<vmem>>, vector<1x128xf32>
    %cst_32 = arith.constant dense<0.000000e+00> : vector<128xf32>
    %68 = vector.multi_reduction <add>, %65, %cst_32 [0] : vector<16x128xf32> to vector<128xf32>
    %69 = vector.shape_cast %68 : vector<128xf32> to vector<1x128xf32>
    %cst_33 = arith.constant 6.250000e-02 : f32
    %70 = vector.broadcast %cst_33 : f32 to vector<1x128xf32>
    %71 = arith.mulf %69, %70 : vector<1x128xf32>
    %72 = arith.mulf %65, %65 : vector<16x128xf32>
    %cst_34 = arith.constant dense<0.000000e+00> : vector<128xf32>
    %73 = vector.multi_reduction <add>, %72, %cst_34 [0] : vector<16x128xf32> to vector<128xf32>
    %74 = vector.shape_cast %73 : vector<128xf32> to vector<1x128xf32>
    %cst_35 = arith.constant 6.250000e-02 : f32
    %75 = vector.broadcast %cst_35 : f32 to vector<1x128xf32>
    %76 = arith.mulf %74, %75 : vector<1x128xf32>
    %77 = arith.mulf %71, %71 : vector<1x128xf32>
    %78 = arith.subf %76, %77 : vector<1x128xf32>
    %cst_36 = arith.constant 0.000000e+00 : f32
    %79 = vector.broadcast %cst_36 : f32 to vector<1x128xf32>
    %80 = arith.maximumf %78, %79 : vector<1x128xf32>
    %cst_37 = arith.constant 9.99999974E-6 : f32
    %81 = vector.broadcast %cst_37 : f32 to vector<1x128xf32>
    %82 = arith.addf %80, %81 : vector<1x128xf32>
    %83 = math.rsqrt %82 : vector<1x128xf32>
    %84 = arith.mulf %66, %83 : vector<1x128xf32>
    %85 = arith.mulf %71, %84 : vector<1x128xf32>
    %86 = arith.subf %67, %85 : vector<1x128xf32>
    %87 = vector.broadcast %84 : vector<1x128xf32> to vector<16x128xf32>
    %88 = arith.mulf %65, %87 : vector<16x128xf32>
    %89 = vector.broadcast %86 : vector<1x128xf32> to vector<16x128xf32>
    %90 = arith.addf %88, %89 : vector<16x128xf32>
    %cst_38 = arith.constant 0.000000e+00 : f32
    %91 = vector.broadcast %cst_38 : f32 to vector<16x128xf32>
    %92 = arith.maximumf %90, %91 : vector<16x128xf32>
    %c0_39 = arith.constant 0 : index
    %c0_40 = arith.constant 0 : index
    %93 = vector.load %arg4[%c0_39, %c0_40] : memref<16x128xf32, #tpu.memory_space<vmem>>, vector<16x128xf32>
    tpu.vector_store %arg4[%c0_39, %c0_40], %92 {strides = array<i32>} : memref<16x128xf32, #tpu.memory_space<vmem>>, vector<16x128xf32>,
    return
  }
}

</mosaic_0001>

<bundles_post_ra>
// kernel: regressor_forward.1
= control target key start
LH: loop header
LB: loop body
LE: loop exit
PB: predicated region body
PF: predicated region fallthrough
CT: control target
= control target key end

     0   :  { %9 = vsyncpa [#allocation3], 0  ;;  %s905_s0 = inlined_call_operand.hbm [shape: f32[16,64], index: 0, kind: input, shape index: {}]   ;;  %s906_s1 = inlined_call_operand.hbm [shape: bf16[64,128], index: 1, kind: input, shape index: {}]   ;;  %s907_s2 = inlined_call_operand.hbm [shape: bf16[2,128,128], index: 2, kind: input, shape index: {}]   ;;  %s908_s3 = inlined_call_operand.hbm [shape: f32[8,128], index: 3, kind: input, shape index: {}]   ;;  %s909_s4 = inlined_call_operand.hbm [shape: f32[16,128], index: 4, kind: output, shape index: {}]  }
   0x1   :  { %10 = vsyncpa [#allocation6], 0 }
   0x2   :  { %11 = vsyncpa [#allocation9], 0 }
   0x3   :  { %12 = vsyncpa [#allocation4], 0  ;;  %s763_s15 = smov [#allocation5]   ;;  %s645_s19 = scalar_lea.hbm %s906_s1, 512 }
   0x4   :  { %s30_s16 = sshll.u32 %s763_s15, 4  ;;  %p646_p0 = scmp.ne.s32.totalorder %s906_s1, %s645_s19  ;;  %s31_s16 = int_to_ptr.vmem [resolvable:$true] %s30_s16 }
   0x5   :  { %p649_p1 = scmp.lt.u32.totalorder %s645_s19, %s906_s1 }
   0x7   :  { %p651_p2 = pnand %p649_p1, %p646_p0 }
   0x9   :  { %654 = shalt.err (!%p651_p2)
}
   0xa   :  { %s655_s24 = scalar_lea.vmem %s31_s16, 512  ;;  %p660_p4 = scmp.lt.s32.totalorder %s31_s16, %s31_s16 }
   0xb   :  { %p656_p3 = scmp.ne.s32.totalorder %s31_s16, %s655_s24  ;;  %p661_p5 = scmp.lt.s32.totalorder %s655_s24, %s655_s24 }
   0xd   :  { %p662_p6 = por %p661_p5, %p660_p4 }
   0xf   :  { %p663_p7 = pnand %p662_p6, %p656_p3 }
  0x11   :  { %666 = shalt.err (!%p663_p7)
}
  0x12   :  { %s764_s25 = smov 64   ;;  %s765_s26 = smov 4  }
  0x13   :  { %36 = dma.hbm_to_vmem [thread:$0]  %s906_s1, 512, %s31_s16, [#allocation6], %s764_s25, %s764_s25, %s765_s26  }
  0x14   :  { %s766_s29 = smov [#allocation2]   ;;  %s667_s7 = scalar_lea.hbm %s905_s0, 256 }
  0x15   :  { %s18_s30 = sshll.u32 %s766_s29, 4  ;;  %p668_p8 = scmp.ne.s32.totalorder %s905_s0, %s667_s7  ;;  %s19_s30 = int_to_ptr.vmem [resolvable:$true] %s18_s30 }
  0x16   :  { %p671_p9 = scmp.lt.u32.totalorder %s667_s7, %s905_s0 }
  0x18   :  { %p673_p10 = pnand %p671_p9, %p668_p8 }
  0x1a   :  { %676 = shalt.err (!%p673_p10)
}
  0x1b   :  { %s677_s12 = scalar_lea.vmem %s19_s30, 256  ;;  %p682_p12 = scmp.lt.s32.totalorder %s19_s30, %s19_s30 }
  0x1c   :  { %p678_p11 = scmp.ne.s32.totalorder %s19_s30, %s677_s12  ;;  %p683_p13 = scmp.lt.s32.totalorder %s677_s12, %s677_s12 }
  0x1e   :  { %p684_p0 = por %p683_p13, %p682_p12 }
  0x20   :  { %p685_p1 = pnand %p684_p0, %p678_p11 }
  0x22   :  { %688 = shalt.err (!%p685_p1)
}
  0x23   :  { %s767_s1 = smov 128   ;;  %s768_s13 = smov 8  }
  0x24   :  { %24 = dma.hbm_to_vmem [thread:$0]  %s905_s0, 256, %s19_s30, [#allocation3], %s767_s1, %s767_s1, %s768_s13  }
  0x25   :  { %s769_s16 = smov [#allocation7]   ;;  %s770_s18 = smov [#allocation8]  }
  0x26   :  { %s42_s17 = sshll.u32 %s769_s16, 4  ;;  %s55_s19 = sshll.u32 %s770_s18, 4  ;;  %s43_s17 = int_to_ptr.vmem [resolvable:$true] %s42_s17  ;;  %s56_s19 = int_to_ptr.vmem [resolvable:$true] %s55_s19 }
  0x27   :  { %s689_s22 = scalar_lea.hbm %s907_s2, 2048 }
  0x28   :  { %p690_p2 = scmp.ne.s32.totalorder %s907_s2, %s689_s22  ;;  %p693_p3 = scmp.lt.u32.totalorder %s689_s22, %s907_s2 }
  0x2a   :  { %p695_p4 = pnand %p693_p3, %p690_p2 }
  0x2c   :  { %698 = shalt.err (!%p695_p4)
}
  0x2d   :  { %s699_s0 = scalar_lea.vmem %s43_s17, 2048  ;;  %p704_p6 = scmp.lt.s32.totalorder %s43_s17, %s43_s17 }
  0x2e   :  { %p700_p5 = scmp.ne.s32.totalorder %s43_s17, %s699_s0  ;;  %p705_p7 = scmp.lt.s32.totalorder %s699_s0, %s699_s0 }
  0x30   :  { %p706_p8 = por %p705_p7, %p704_p6 }
  0x32   :  { %p707_p9 = pnand %p706_p8, %p700_p5 }
  0x34   :  { %710 = shalt.err (!%p707_p9)
}
  0x35   :  { %48 = dma.hbm_to_vmem [thread:$0]  %s907_s2, 2048, %s43_s17, [#allocation6], %s764_s25, %s764_s25, %s765_s26  }
  0x36   :  { %s711_s7 = scalar_lea.hbm %s908_s3, 128 }
  0x37   :  { %p712_p10 = scmp.ne.s32.totalorder %s908_s3, %s711_s7  ;;  %p715_p11 = scmp.lt.u32.totalorder %s711_s7, %s908_s3 }
  0x39   :  { %p717_p12 = pnand %p715_p11, %p712_p10 }
  0x3b   :  { %720 = shalt.err (!%p717_p12)
}
  0x3c   :  { %s721_s12 = scalar_lea.vmem %s56_s19, 128  ;;  %p726_p0 = scmp.lt.s32.totalorder %s56_s19, %s56_s19 }
  0x3d   :  { %p722_p13 = scmp.ne.s32.totalorder %s56_s19, %s721_s12  ;;  %p727_p1 = scmp.lt.s32.totalorder %s721_s12, %s721_s12 }
  0x3f   :  { %p728_p2 = por %p727_p1, %p726_p0 }
  0x41   :  { %p729_p3 = pnand %p728_p2, %p722_p13 }
  0x43   :  { %732 = shalt.err (!%p729_p3)
}
  0x44   :  { %58 = dma.hbm_to_vmem [thread:$0]  %s908_s3, 128, %s56_s19, [#allocation9]  }
  0x45   :  { %755 = dma.done.wait [#allocation3], 256  }
  0x46   :  { %756 = vsyncadd [#allocation3], 4294967040 }
  0x47   :  { %757 = dma.done.wait [#allocation6], 2560  }
  0x48   :  { %758 = vsyncadd [#allocation6], 4294964736 }
  0x49   :  { %759 = dma.done.wait [#allocation9], 128  }
  0x4a   :  { %760 = vsyncadd [#allocation9], 4294967168  ;;  %v771_v0 = vmov 0.0   ;;  %vm772_vm0 = vmmov 0   ;;  %v619_v1 = vld [vmem:[#allocation5] sm:$0xff]   ;;  %v620_v2 = vld [vmem:[#allocation5 + $0x8] sm:$0xff]   ;;  %v180_v42 = vlaneseq }
  0x4b   :  { %556 = vmatprep.subr.bf16.mxu0 %v771_v0  ;;  %564 = vmatprep.mubr.msk.bf16.mxu0 %vm772_vm0, %v771_v0  ;;  %v621_v3 = vld [vmem:[#allocation5 + $0x10] sm:$0xff]   ;;  %vm107_vm1 = vcmask 523264   ;;  %v622_v4 = vld [vmem:[#allocation5 + $0x18] sm:$0xff]   ;;  %v623_v8 = vld [vmem:[#allocation7] sm:$0xff]   ;;  %s773_s3 = smov [#allocation10]  }
  0x4c   :  { %568 = vmatprep.subr.bf16.mxu1 %v771_v0  ;;  %584 = vmatprep.mubr.msk.bf16.mxu1 %vm772_vm0, %v771_v0  ;;  %v72_v5 = vld [vmem:[#allocation2] sm:$0xff]  ;;  %v73_v6 = vld [vmem:[#allocation2 + $0x8] sm:$0xff]  ;;  %v624_v9 = vld [vmem:[#allocation7 + $0x8] sm:$0xff]   ;;  %v181_v43 = vshrl.u32 %v180_v42, 7  ;;  %s498_s26 = sshll.u32 %s773_s3, 4  ;;  %s499_s26 = int_to_ptr.vmem [resolvable:$true] %s498_s26 }
  0x4d   :  { %557 = vmatpush3.bf16.msra.mxu0 %v619_v1  ;;  %v74_v7 = vpack.c.bf16 %v73_v6, %v72_v5  ;;  %569 = vmatpush3.bf16.msra.mxu1 %v623_v8  ;;  %v625_v10 = vld [vmem:[#allocation7 + $0x10] sm:$0xff]   ;;  %v626_v11 = vld [vmem:[#allocation7 + $0x18] sm:$0xff]   ;;  %v627_v12 = vld [vmem:[#allocation7 + $0x20] sm:$0xff]   ;;  %s733_s14 = scalar_lea.vmem %s499_s26, 256  ;;  %p738_p5 = scmp.lt.s32.totalorder %s499_s26, %s499_s26 }
  0x4e   :  { %558 = vmatprep.subr.bf16.mxu0 %v771_v0  ;;  %570 = vmatprep.subr.bf16.mxu1 %v771_v0  ;;  %v628_v13 = vld [vmem:[#allocation7 + $0x28] sm:$0xff]   ;;  %v629_v14 = vld [vmem:[#allocation7 + $0x30] sm:$0xff]   ;;  %v630_v15 = vld [vmem:[#allocation7 + $0x38] sm:$0xff]   ;;  %v875_v45 = vsub.s32 0, %v181_v43  ;;  %p734_p4 = scmp.ne.s32.totalorder %s499_s26, %s733_s14  ;;  %p739_p6 = scmp.lt.s32.totalorder %s733_s14, %s733_s14 }
  0x4f   :  { %v152_v44 = vld [vmem:[#allocation8] sm:$0x1]  ;;  %v153_v48 = vld [vmem:[#allocation8 + $0x1] sm:$0x1]  ;;  %v632_v61 = vld [vmem:[#allocation7 + $0x48] sm:$0xff]  }
  0x50   :  { %v631_v60 = vld [vmem:[#allocation7 + $0x40] sm:$0xff]   ;;  %v633_v62 = vld [vmem:[#allocation7 + $0x50] sm:$0xff]   ;;  %v634_v63 = vld [vmem:[#allocation7 + $0x58] sm:$0xff]   ;;  %p740_p7 = por %p739_p6, %p738_p5 }
  0x51   :  { %559 = vmatpush3.bf16.msra.mxu0 %v620_v2  ;;  %571 = vmatpush3.bf16.msra.mxu1 %v624_v9  ;;  %v635_v1 = vld [vmem:[#allocation7 + $0x60] sm:$0xff]   ;;  %v636_v2 = vld [vmem:[#allocation7 + $0x68] sm:$0xff]  }
  0x52   :  { %560 = vmatprep.subr.bf16.mxu0 %v771_v0  ;;  %572 = vmatprep.subr.bf16.mxu1 %v771_v0  ;;  %p741_p8 = pnand %p740_p7, %p734_p4 }
  0x55   :  { %561 = vmatpush3.bf16.msra.mxu0 %v621_v3  ;;  %573 = vmatpush3.bf16.msra.mxu1 %v625_v10  ;;  %v637_v3 = vld [vmem:[#allocation7 + $0x70] sm:$0xff]  }
  0x56   :  { %562 = vmatprep.subr.bf16.mxu0 %v771_v0  ;;  %574 = vmatprep.subr.bf16.mxu1 %v771_v0 }
  0x59   :  { %563 = vmatpush3.bf16.msra.mxu0 %v622_v4  ;;  %575 = vmatpush3.bf16.msra.mxu1 %v626_v11  ;;  %v638_v4 = vld [vmem:[#allocation7 + $0x78] sm:$0xff]  }
  0x5a   :  { %588 = vmatprep.subr.bf16.mxu0 %v771_v0  ;;  %576 = vmatprep.subr.bf16.mxu1 %v771_v0 }
  0x5c   :  { %565 = vmatmul.mubr.msk.bf16.vlgmr.msra.gmra.mrb[0].mxu0 %vm107_vm1, %v74_v7 }
  0x5d   :  { %604 = vmatprep.mubr.msk.bf16.mxu0 %vm772_vm0, %v771_v0  ;;  %577 = vmatpush3.bf16.msra.mxu1 %v627_v12 }
  0x5e   :  { %578 = vmatprep.subr.bf16.mxu1 %v771_v0  ;;  %589 = vmatpush3.bf16.msra.mxu0 %v631_v60 }
  0x5f   :  { %590 = vmatprep.subr.bf16.mxu0 %v771_v0 }
  0x61   :  { %579 = vmatpush3.bf16.msra.mxu1 %v628_v13 }
  0x62   :  { %580 = vmatprep.subr.bf16.mxu1 %v771_v0  ;;  %591 = vmatpush3.bf16.msra.mxu0 %v632_v61 }
  0x63   :  { %592 = vmatprep.subr.bf16.mxu0 %v771_v0 }
  0x65   :  { %581 = vmatpush3.bf16.msra.mxu1 %v629_v14 }
  0x66   :  { %582 = vmatprep.subr.bf16.mxu1 %v771_v0  ;;  %593 = vmatpush3.bf16.msra.mxu0 %v633_v62 }
  0x67   :  { %594 = vmatprep.subr.bf16.mxu0 %v771_v0 }
  0x69   :  { %583 = vmatpush3.bf16.msra.mxu1 %v630_v15 }
  0x6a   :  { %595 = vmatpush3.bf16.msra.mxu0 %v634_v63 }
  0x6b   :  { %596 = vmatprep.subr.bf16.mxu0 %v771_v0 }
  0x6e   :  { %597 = vmatpush3.bf16.msra.mxu0 %v635_v1 }
  0x6f   :  { %598 = vmatprep.subr.bf16.mxu0 %v771_v0 }
  0x72   :  { %599 = vmatpush3.bf16.msra.mxu0 %v636_v2 }
  0x73   :  { %600 = vmatprep.subr.bf16.mxu0 %v771_v0 }
  0x76   :  { %601 = vmatpush3.bf16.msra.mxu0 %v637_v3 }
  0x77   :  { %602 = vmatprep.subr.bf16.mxu0 %v771_v0 }
  0x7a   :  { %603 = vmatpush3.bf16.msra.mxu0 %v638_v4 }
 0x12f   :  { %v145_v16 = vpop.f32.mrb[0].mxu0 }
 0x130   :  { %v566_v17 = vpop.f32.mrb[1].mxu0  ;;  %v162_v19 = vmul.f32 %v145_v16, %v145_v16 }
 0x131   :  { %v148_v18 = vpop.f32.mrb[2].mxu0 }
 0x132   :  { %v154_v20 = vadd.f32 %v148_v18, %v145_v16  ;;  %v163_v21 = vmul.f32 %v148_v18, %v148_v18  ;;  %v567_v22 = vpop.f32.mrb[3].mxu0 }
 0x134   :  { %v155_v23 = vrot.slane %v154_v20, 4  ;;  %v164_v24 = vadd.f32 %v163_v21, %v162_v19 }
 0x136   :  { %v156_v25 = vadd.f32 %v155_v23, %v154_v20  ;;  %v165_v26 = vrot.slane %v164_v24, 4 }
 0x138   :  { %v157_v27 = vrot.slane %v156_v25, 2  ;;  %v166_v28 = vadd.f32 %v165_v26, %v164_v24 }
 0x13a   :  { %v158_v29 = vadd.f32 %v157_v27, %v156_v25  ;;  %v167_v30 = vrot.slane %v166_v28, 2 }
 0x13c   :  { %v159_v31 = vrot.slane %v158_v29, 1  ;;  %v168_v32 = vadd.f32 %v167_v30, %v166_v28  ;;  %v300_v30 = vld [vmem:[#allocation8 + $0x2] sm:$0x1] }
 0x13e   :  { %v160_v33 = vadd.f32 %v159_v31, %v158_v29  ;;  %v169_v34 = vrot.slane %v168_v32, 1 }
 0x140   :  { %v161_v35 = vmul.f32 0.0625, %v160_v33  ;;  %v170_v36 = vadd.f32 %v169_v34, %v168_v32  ;;  %v301_v33 = vld [vmem:[#allocation8 + $0x3] sm:$0x1] }
 0x142   :  { %v171_v37 = vmul.f32 0.0625, %v170_v36  ;;  %v172_v38 = vmul.f32 %v161_v35, %v161_v35 }
 0x144   :  { %v173_v39 = vsub.f32 %v171_v37, %v172_v38 }
 0x146   :  { %v174_v40 = vmax.f32 %v173_v39, 0.0 }
 0x148   :  { %v175_v41 = vadd.f32 1e-05, %v174_v40 }
 0x14a   :  { %639 = vrsqrt.f32 %v175_v41 }
 0x154   :  { %v640_v46 = vpop.eup %639 }
 0x155   :  { %v177_v47 = vmul.f32 %v640_v46, %v152_v44 }
 0x157   :  { %v178_v49 = vmul.f32 %v177_v47, %v161_v35  ;;  %v183_v50 = vrot.slane %v177_v47, %v875_v45 }
 0x159   :  { %v179_v51 = vsub.f32 %v153_v48, %v178_v49  ;;  %v184_v52 = vmul.f32 %v183_v50, %v145_v16  ;;  %v185_v53 = vmul.f32 %v183_v50, %v148_v18 }
 0x15b   :  { %v189_v54 = vrot.slane %v179_v51, %v875_v45 }
 0x15d   :  { %v191_v55 = vadd.f32 %v189_v54, %v185_v53  ;;  %v190_v56 = vadd.f32 %v189_v54, %v184_v52 }
 0x15f   :  { %v192_v57 = vmax.f32 %v190_v56, 0.0  ;;  %v193_v58 = vmax.f32 %v191_v55, 0.0 }
 0x161   :  { %v194_v59 = vpack.c.bf16 %v193_v58, %v192_v57 }
 0x163   :  { %585 = vmatmul.mubr.bf16.vlgmr.msra.gmra.mrb[0].mxu1 %v194_v59 }
 0x236   :  { %v293_v5 = vpop.f32.mrb[0].mxu1 }
 0x237   :  { %v586_v6 = vpop.f32.mrb[1].mxu1  ;;  %v310_v8 = vmul.f32 %v293_v5, %v293_v5 }
 0x238   :  { %v296_v7 = vpop.f32.mrb[2].mxu1 }
 0x239   :  { %v302_v9 = vadd.f32 %v296_v7, %v293_v5  ;;  %v311_v10 = vmul.f32 %v296_v7, %v296_v7  ;;  %v587_v11 = vpop.f32.mrb[3].mxu1 }
 0x23b   :  { %v303_v12 = vrot.slane %v302_v9, 4  ;;  %v312_v13 = vadd.f32 %v311_v10, %v310_v8 }
 0x23d   :  { %v304_v14 = vadd.f32 %v303_v12, %v302_v9  ;;  %v313_v15 = vrot.slane %v312_v13, 4  ;;  %v449_v9 = vld [vmem:[#allocation8 + $0x4] sm:$0x1]  ;;  %v450_v12 = vld [vmem:[#allocation8 + $0x5] sm:$0x1] }
 0x23f   :  { %v305_v16 = vrot.slane %v304_v14, 2  ;;  %v314_v17 = vadd.f32 %v313_v15, %v312_v13 }
 0x241   :  { %v306_v18 = vadd.f32 %v305_v16, %v304_v14  ;;  %v315_v19 = vrot.slane %v314_v17, 2 }
 0x243   :  { %v307_v20 = vrot.slane %v306_v18, 1  ;;  %v316_v21 = vadd.f32 %v315_v19, %v314_v17 }
 0x245   :  { %v308_v0 = vadd.f32 %v307_v20, %v306_v18  ;;  %v317_v22 = vrot.slane %v316_v21, 1 }
 0x247   :  { %v309_v23 = vmul.f32 0.0625, %v308_v0  ;;  %v318_v24 = vadd.f32 %v317_v22, %v316_v21 }
 0x249   :  { %v319_v25 = vmul.f32 0.0625, %v318_v24  ;;  %v320_v26 = vmul.f32 %v309_v23, %v309_v23 }
 0x24b   :  { %v321_v27 = vsub.f32 %v319_v25, %v320_v26 }
 0x24d   :  { %v322_v28 = vmax.f32 %v321_v27, 0.0 }
 0x24f   :  { %v323_v29 = vadd.f32 1e-05, %v322_v28 }
 0x251   :  { %641 = vrsqrt.f32 %v323_v29 }
 0x25b   :  { %v642_v31 = vpop.eup %641 }
 0x25c   :  { %v325_v32 = vmul.f32 %v642_v31, %v300_v30 }
 0x25e   :  { %v326_v34 = vmul.f32 %v325_v32, %v309_v23  ;;  %v331_v35 = vrot.slane %v325_v32, %v875_v45 }
 0x260   :  { %v327_v36 = vsub.f32 %v301_v33, %v326_v34  ;;  %v332_v37 = vmul.f32 %v331_v35, %v293_v5  ;;  %v333_v38 = vmul.f32 %v331_v35, %v296_v7 }
 0x262   :  { %v337_v39 = vrot.slane %v327_v36, %v875_v45 }
 0x264   :  { %v338_v40 = vadd.f32 %v337_v39, %v332_v37  ;;  %v339_v41 = vadd.f32 %v337_v39, %v333_v38 }
 0x266   :  { %v341_v42 = vmax.f32 %v339_v41, 0.0  ;;  %v340_v43 = vmax.f32 %v338_v40, 0.0 }
 0x268   :  { %v342_v44 = vpack.c.bf16 %v341_v42, %v340_v43 }
 0x26a   :  { %605 = vmatmul.mubr.bf16.vlgmr.msra.gmra.mrb[4].mxu0 %v342_v44 }
 0x33d   :  { %v442_v46 = vpop.f32.mrb[4].mxu0 }
 0x33e   :  { %v606_v47 = vpop.f32.mrb[5].mxu0  ;;  %v459_v49 = vmul.f32 %v442_v46, %v442_v46 }
 0x33f   :  { %v445_v48 = vpop.f32.mrb[6].mxu0 }
 0x340   :  { %v451_v50 = vadd.f32 %v445_v48, %v442_v46  ;;  %v460_v51 = vmul.f32 %v445_v48, %v445_v48  ;;  %v607_v52 = vpop.f32.mrb[7].mxu0 }
 0x342   :  { %v452_v53 = vrot.slane %v451_v50, 4  ;;  %v461_v54 = vadd.f32 %v460_v51, %v459_v49 }
 0x344   :  { %v453_v55 = vadd.f32 %v452_v53, %v451_v50  ;;  %v462_v56 = vrot.slane %v461_v54, 4 }
 0x346   :  { %v454_v57 = vrot.slane %v453_v55, 2  ;;  %v463_v58 = vadd.f32 %v462_v56, %v461_v54 }
 0x348   :  { %v455_v59 = vadd.f32 %v454_v57, %v453_v55  ;;  %v464_v60 = vrot.slane %v463_v58, 2 }
 0x34a   :  { %v456_v61 = vrot.slane %v455_v59, 1  ;;  %v465_v62 = vadd.f32 %v464_v60, %v463_v58 }
 0x34c   :  { %v457_v63 = vadd.f32 %v456_v61, %v455_v59  ;;  %v466_v1 = vrot.slane %v465_v62, 1 }
 0x34e   :  { %v458_v2 = vmul.f32 0.0625, %v457_v63  ;;  %v467_v3 = vadd.f32 %v466_v1, %v465_v62 }
 0x350   :  { %v468_v4 = vmul.f32 0.0625, %v467_v3  ;;  %v469_v5 = vmul.f32 %v458_v2, %v458_v2 }
 0x352   :  { %v470_v6 = vsub.f32 %v468_v4, %v469_v5 }
 0x354   :  { %v471_v7 = vmax.f32 %v470_v6, 0.0 }
 0x356   :  { %v472_v8 = vadd.f32 1e-05, %v471_v7 }
 0x358   :  { %643 = vrsqrt.f32 %v472_v8 }
 0x362   :  { %v644_v10 = vpop.eup %643 }
 0x363   :  { %v474_v11 = vmul.f32 %v644_v10, %v449_v9 }
 0x365   :  { %v475_v13 = vmul.f32 %v474_v11, %v458_v2  ;;  %v480_v14 = vrot.slane %v474_v11, %v875_v45 }
 0x367   :  { %v476_v15 = vsub.f32 %v450_v12, %v475_v13  ;;  %v481_v16 = vmul.f32 %v480_v14, %v442_v46  ;;  %v482_v17 = vmul.f32 %v480_v14, %v445_v48 }
 0x369   :  { %v486_v18 = vrot.slane %v476_v15, %v875_v45 }
 0x36b   :  { %v488_v19 = vadd.f32 %v486_v18, %v482_v17  ;;  %v487_v20 = vadd.f32 %v486_v18, %v481_v16 }
 0x36d   :  { %v489_v21 = vmax.f32 %v487_v20, 0.0  ;;  %v490_v0 = vmax.f32 %v488_v19, 0.0 }
 0x36f   :  { %491 = vst [vmem:[#allocation10] sm:$0xff] %v489_v21  ;;  %492 = vst [vmem:[#allocation10 + $0x8] sm:$0xff] %v490_v0 }
 0x370   :  { %744 = shalt.err (!%p741_p8)
}
 0x371   :  { %s745_s17 = scalar_lea.hbm %s909_s4, 256 }
 0x372   :  { %p746_p9 = scmp.ne.s32.totalorder %s909_s4, %s745_s17  ;;  %p749_p10 = scmp.lt.u32.totalorder %s745_s17, %s909_s4 }
 0x374   :  { %p751_p11 = pnand %p749_p10, %p746_p9 }
 0x376   :  { %754 = shalt.err (!%p751_p11)
}
 0x377   :  { %504 = dma.vmem_to_hbm [thread:$0]  %s499_s26, 256, %s909_s4, [#allocation4], %s767_s1, %s767_s1, %s768_s13  }
 0x378   :  { %761 = dma.done.wait [#allocation4], 256  }
 0x379   :  { %762 = vsyncadd [#allocation4], 4294967040 }
 0x37a   :  { %508 = vsyncpa [#allocation3], 1 }
 0x37b   :  { %509 = vsyncpa [#allocation6], 1 }
 0x37c   :  { %510 = vsyncpa [#allocation9], 1 }
 0x37d   :  { %511 = vsyncpa [#allocation4], 1 }

</bundles_post_ra>
